<compile_context>
chip_gen: v5e
topology: v5e:2x2
jax: 0.10.0
libtpu: 0.0.40
codegen_flags: <defaults>
</compile_context>

<pallas_src>
import jax
import jax.numpy as jnp
from jax.experimental import pallas as pl
from jax.experimental.pallas import tpu as pltpu

_LANE = 128      # TPU lane width: class dim padded to this for unmasked stores
_SUBLANE = 8     # sublane granularity for the batch tile
_MAX_TB = 1024   # max batch-tile rows; large tiles amortize ~600-cycle/step cost


def _round_up(x, m):
    return ((x + m - 1) // m) * m


def _linear_kernel(x_ref, w_ref, b_ref, o_ref):
    # x_ref: (TB, D)  w_ref: (D, Np)  b_ref: (1, Np)  o_ref: (TB, Np)
    # MXU matmul with fp32 accumulation + VPU bias broadcast-add.
    acc = jnp.dot(x_ref[...], w_ref[...], preferred_element_type=jnp.float32)
    o_ref[...] = (acc + b_ref[...]).astype(o_ref.dtype)


def prepare_classifier_params(weight, bias):
    """One-time (init-time) parameter preparation.

    weight: (n_way, dim) PyTorch nn.Linear layout
    bias:   (n_way,)
    Returns (w_t_padded (dim, Np), b_padded (1, Np)) with Np = round_up(n_way, 128),
    extra columns zero so they don't affect the valid outputs.
    """
    n_way, dim = weight.shape
    n_pad = _round_up(max(n_way, 1), _LANE)
    w_t = jnp.zeros((dim, n_pad), jnp.float32).at[:, :n_way].set(
        weight.T.astype(jnp.float32))
    b2d = jnp.zeros((1, n_pad), jnp.float32).at[:, :n_way].set(
        bias.astype(jnp.float32))
    return w_t, b2d


def classifier_forward(x, w_t_padded, b_padded, n_way):
    """Equivalent of PyTorch Classifier.forward (fp32).

    x:           (B, dim)  float32
    w_t_padded:  (dim, Np) float32  (pre-transposed, lane-padded; from prepare_*)
    b_padded:    (1, Np)   float32
    returns      (B, n_way) float32
    """
    B, D = x.shape
    Np = w_t_padded.shape[1]

    # Batch tiling: weight/bias stay VMEM-resident (constant index_map); x and
    # out tiles are streamed and double-buffered by the BlockSpec pipeline.
    TB = min(_MAX_TB, _round_up(B, _SUBLANE))
    Bp = _round_up(B, TB)
    x_p = x if Bp == B else jnp.pad(x, ((0, Bp - B), (0, 0)))

    out = pl.pallas_call(
        _linear_kernel,
        out_shape=jax.ShapeDtypeStruct((Bp, Np), jnp.float32),
        grid=(Bp // TB,),
        in_specs=[
            pl.BlockSpec((TB, D), lambda i: (i, 0)),   # streamed x tile
            pl.BlockSpec((D, Np), lambda i: (0, 0)),   # resident weight
            pl.BlockSpec((1, Np), lambda i: (0, 0)),   # resident bias
        ],
        out_specs=pl.BlockSpec((TB, Np), lambda i: (i, 0)),  # lane-dense store
        compiler_params=pltpu.CompilerParams(
            dimension_semantics=("parallel",),  # lets v7x split batch over 2 TCs
        ),
    )(x_p, w_t_padded, b_padded)

    # Strip batch padding and lane padding of the class dim (cheap XLA slice).
    return out[:B, :n_way]


if __name__ == "__main__":
    # Small shapes consistent with the module: dim=32 features, n_way=5 classes.
    B, DIM, N_WAY = 8, 32, 5

    key = jax.random.PRNGKey(0)
    kx, kw, kb = jax.random.split(key, 3)

    x = jax.random.normal(kx, (B, DIM), dtype=jnp.float32)
    # Deterministic param init mimicking nn.Linear's uniform(-1/sqrt(dim), 1/sqrt(dim)).
    bound = 1.0 / (DIM ** 0.5)
    weight = jax.random.uniform(kw, (N_WAY, DIM), minval=-bound, maxval=bound,
                                dtype=jnp.float32)
    bias = jax.random.uniform(kb, (N_WAY,), minval=-bound, maxval=bound,
                              dtype=jnp.float32)

    # Init-time prep: transpose + lane padding happen once, outside the call path.
    w_t, b2d = prepare_classifier_params(weight, bias)

    out = classifier_forward(x, w_t, b2d, N_WAY)
    out = jax.block_until_ready(out)

    # Reference check against plain JAX (same math as torch nn.Linear).
    ref = x @ weight.T + bias
    assert out.shape == (B, N_WAY)
    assert jnp.allclose(out, ref, atol=1e-5, rtol=1e-5)

    print("KERNEL_OK")
</pallas_src>

<mosaic_0001>
module attributes {stable_mosaic.version = 11 : i64} {
  func.func @_linear_kernel(%arg0: i32, %arg1: memref<8x32xf32, #tpu.memory_space<vmem>>, %arg2: memref<32x128xf32, #tpu.memory_space<vmem>>, %arg3: memref<1x128xf32, #tpu.memory_space<vmem>>, %arg4: memref<8x128xf32, #tpu.memory_space<vmem>>) attributes {dimension_semantics = [#tpu.dimension_semantics<parallel>], iteration_bounds = array<i64: 1>, scalar_prefetch = 0 : i64, scratch_operands = 0 : i64, tpu.core_type = #tpu.core_type<tc>, window_params = [{transform_indices = @transform_0, window_bounds = array<i64: 8, 32>}, {pipeline_mode = #tpu.pipeline_mode<synchronous>, transform_indices = @transform_1, window_bounds = array<i64: 32, 128>}, {pipeline_mode = #tpu.pipeline_mode<synchronous>, transform_indices = @transform_2, window_bounds = array<i64: 1, 128>}, {transform_indices = @transform_3, window_bounds = array<i64: 8, 128>}]} {
    %c0 = arith.constant 0 : index
    %c0_0 = arith.constant 0 : index
    %0 = vector.load %arg1[%c0, %c0_0] : memref<8x32xf32, #tpu.memory_space<vmem>>, vector<8x32xf32>
    %c0_1 = arith.constant 0 : index
    %c0_2 = arith.constant 0 : index
    %1 = vector.load %arg2[%c0_1, %c0_2] : memref<32x128xf32, #tpu.memory_space<vmem>>, vector<32x128xf32>
    %cst = arith.constant dense<0.000000e+00> : vector<8x128xf32>
    %2 = tpu.matmul %0, %1, %cst {dimension_numbers = #tpu.dot_dimension_numbers<[1], [0], [0], [1], [0, 0, 1, 1], [], []>} : vector<8x32xf32>, vector<32x128xf32>, vector<8x128xf32> -> vector<8x128xf32>
    %c0_3 = arith.constant 0 : index
    %c0_4 = arith.constant 0 : index
    %3 = vector.load %arg3[%c0_3, %c0_4] : memref<1x128xf32, #tpu.memory_space<vmem>>, vector<1x128xf32>
    %4 = vector.broadcast %3 : vector<1x128xf32> to vector<8x128xf32>
    %5 = arith.addf %2, %4 : vector<8x128xf32>
    %c0_5 = arith.constant 0 : index
    %c0_6 = arith.constant 0 : index
    %6 = vector.load %arg4[%c0_5, %c0_6] : memref<8x128xf32, #tpu.memory_space<vmem>>, vector<8x128xf32>
    tpu.vector_store %arg4[%c0_5, %c0_6], %5 {strides = array<i32>} : memref<8x128xf32, #tpu.memory_space<vmem>>, vector<8x128xf32>,
    return
  }
  func.func @transform_0(%arg0: i32) -> (i32, i32) {
    %c0_i32 = arith.constant 0 : i32
    %c0_i32_0 = arith.constant 0 : i32
    return %arg0, %c0_i32 : i32, i32
  }
  func.func @transform_1(%arg0: i32) -> (i32, i32) {
    %c0_i32 = arith.constant 0 : i32
    %c0_i32_0 = arith.constant 0 : i32
    %c0_i32_1 = arith.constant 0 : i32
    return %c0_i32, %c0_i32_0 : i32, i32
  }
  func.func @transform_2(%arg0: i32) -> (i32, i32) {
    %c0_i32 = arith.constant 0 : i32
    %c0_i32_0 = arith.constant 0 : i32
    %c0_i32_1 = arith.constant 0 : i32
    return %c0_i32, %c0_i32_0 : i32, i32
  }
  func.func @transform_3(%arg0: i32) -> (i32, i32) {
    %c0_i32 = arith.constant 0 : i32
    %c0_i32_0 = arith.constant 0 : i32
    return %arg0, %c0_i32 : i32, i32
  }
}

</mosaic_0001>

<bundles_post_ra>
// kernel: tpu_custom_call.1
= control target key start
LH: loop header
LB: loop body
LE: loop exit
PB: predicated region body
PF: predicated region fallthrough
CT: control target
= control target key end

     0   :  { %8 = vsyncpa [#allocation3], 0  ;;  %s219_s0 = inlined_call_operand.hbm [shape: f32[8,32], index: 0, kind: input, shape index: {}]   ;;  %s220_s1 = inlined_call_operand.hbm [shape: f32[32,128], index: 1, kind: input, shape index: {}]   ;;  %s221_s2 = inlined_call_operand.vmem [shape: f32[1,128], index: 2, kind: input, shape index: {}]   ;;  %s222_s3 = inlined_call_operand.hbm [shape: f32[8,128], index: 3, kind: output, shape index: {}]  }
   0x1   :  { %9 = vsyncpa [#allocation6], 0 }
   0x2   :  { %10 = vsyncpa [#allocation4], 0  ;;  %s16_s14 = sshll.u32 %s219_s0, 4  ;;  %s182_s15 = smov [#allocation2]   ;;  %s17_s14 = int_to_ptr.hbm [resolvable:$true] %s16_s14 }
   0x3   :  { %s18_s16 = sshll.u32 %s182_s15, 4  ;;  %s26_s19 = sshll.u32 %s220_s1, 4  ;;  %s19_s16 = int_to_ptr.vmem [resolvable:$true] %s18_s16  ;;  %s27_s19 = int_to_ptr.hbm [resolvable:$true] %s26_s19 }
   0x4   :  { %21 = dma.hbm_to_vmem [thread:$0]  %s17_s14, 128, %s19_s16, [#allocation3]  }
   0x5   :  { %s183_s20 = smov [#allocation5]   ;;  %s184_s22 = smov 128  }
   0x6   :  { %s28_s21 = sshll.u32 %s183_s20, 4  ;;  %s185_s23 = smov 8   ;;  %s29_s21 = int_to_ptr.vmem [resolvable:$true] %s28_s21 }
   0x7   :  { %34 = dma.hbm_to_vmem [thread:$0]  %s27_s19, 512, %s29_s21, [#allocation6], %s184_s22, %s184_s22, %s185_s23  }
   0x8   :  { %176 = dma.done.wait [#allocation3], 128  }
   0x9   :  { %177 = vsyncadd [#allocation3], 4294967168 }
   0xa   :  { %178 = dma.done.wait [#allocation6], 512  }
   0xb   :  { %179 = vsyncadd [#allocation6], 4294966784  ;;  %v49_v0 = vld [vmem:[#allocation5 + $0x18] sm:$0xff]  ;;  %v48_v1 = vld [vmem:[#allocation5 + $0x10] sm:$0xff]  ;;  %vm54_vm0 = vcmask 261120   ;;  %s186_s24 = smov [#allocation7]  }
   0xc   :  { %70 = vmatpush.msra.mxu0 %v49_v0  ;;  %v47_v2 = vld [vmem:[#allocation5 + $0x8] sm:$0xff]  ;;  %v46_v3 = vld [vmem:[#allocation5] sm:$0xff]  ;;  %v45_v4 = vld [vmem:[#allocation2] sm:$0xff]  ;;  %s84_s25 = sshll.u32 %s186_s24, 4  ;;  %s86_s28 = sshll.u32 %s222_s3, 4  ;;  %s85_s25 = int_to_ptr.vmem [resolvable:$true] %s84_s25  ;;  %s87_s28 = int_to_ptr.hbm [resolvable:$true] %s86_s28 }
   0xd   :  { %v103_v5 = vld [vmem:[%s221_s2] ss:$0 sm:$0xff] }
   0xe   :  { %71 = vmatpush.msra.mxu0 %v48_v1 }
  0x10   :  { %72 = vmatpush.msra.mxu0 %v47_v2 }
  0x12   :  { %73 = vmatpush.msra.mxu0 %v46_v3 }
  0x13   :  { %97 = vmatmul.msk.f32.vlgmr.msra.gmra.mxu0 %vm54_vm0, %v45_v4 }
  0x90   :  { %v75_v6 = vpop.f32.mrf.mxu0 }
  0x91   :  { %v76_v7 = vadd.f32 %v103_v5, %v75_v6 }
  0x93   :  { %78 = vst [vmem:[#allocation7] sm:$0xff] %v76_v7 }
  0x94   :  { %89 = dma.vmem_to_hbm [thread:$0]  %s85_s25, 128, %s87_s28, [#allocation4]  }
  0x95   :  { %180 = dma.done.wait [#allocation4], 128  }
  0x96   :  { %181 = vsyncadd [#allocation4], 4294967168 }
  0x97   :  { %94 = vsyncpa [#allocation3], 1 }
  0x98   :  { %95 = vsyncpa [#allocation6], 1 }
  0x99   :  { %96 = vsyncpa [#allocation4], 1 }

</bundles_post_ra>
